<compile_context>
chip_gen: v7x
topology: tpu7x:2x2x1
jax: 0.10.0
libtpu: 0.0.40
codegen_flags: <defaults>
</compile_context>

<pallas_src>
import jax
import jax.numpy as jnp
from jax import lax
from jax.experimental import pallas as pl
from jax.experimental.pallas import tpu as pltpu


def _self_attn_kernel(x_ref, wqkv_ref, bqkv_ref, gamma_ref, out_ref):
    B, _, H = x_ref.shape
    wqkv = wqkv_ref[...]          # (H, 3H) bf16, pre-transposed [Wq^T | Wk^T | Wv^T]
    bqkv = bqkv_ref[...]          # (1, 3H) f32, fused bias
    gamma = gamma_ref[0]          # f32 scalar, read on the scalar/SMEM path

    for b in range(B):            # static unroll; one kernel call, no grid overhead
        xb = x_ref[b]             # (L, H) f32

        # Fused QKV projection: one MXU push, bf16 inputs, f32 accumulation,
        # one fused bias broadcast instead of three.
        qkv = jnp.dot(xb.astype(jnp.bfloat16), wqkv,
                      preferred_element_type=jnp.float32) + bqkv       # (L, 3H)
        q = qkv[:, :H]
        k = qkv[:, H:2 * H]
        v = qkv[:, 2 * H:]

        # energy[i, j] = sum_l q[l, i] * k[l, j]   -> (H, H)
        energy = lax.dot_general(q.astype(jnp.bfloat16), k.astype(jnp.bfloat16),
                                 (((0,), (0,)), ((), ())),
                                 preferred_element_type=jnp.float32)

        # numerically-stable softmax over the last axis (f32; exp + approx
        # reciprocal go to the EUP slot instead of the VALU)
        m = jnp.max(energy, axis=-1, keepdims=True)
        e = jnp.exp(energy - m)
        attn = e * pl.reciprocal(jnp.sum(e, axis=-1, keepdims=True), approx=True)

        # out[l, i] = sum_j v[l, j] * attn[i, j]   -> (L, H)
        o = lax.dot_general(v.astype(jnp.bfloat16), attn.astype(jnp.bfloat16),
                            (((1,), (1,)), ((), ())),
                            preferred_element_type=jnp.float32)

        out_ref[b] = gamma * o + xb


def self_attn_pallas(x, wq, wk, wv, bq, bk, bv, gamma):
    """x: (B, L, H) f32; wq/wk/wv: (H, H) nn.Linear weights.  Returns (B, L, H) f32."""
    B, L, H = x.shape
    # Fuse + pre-transpose ONCE in the wrapper: nn.Linear is y = x @ W^T, so
    # store W^T directly -> the kernel sees a canonical [M,K]x[K,N] matmul and
    # no per-call operand transposes.
    wqkv_t = jnp.concatenate([wq.T, wk.T, wv.T], axis=1).astype(jnp.bfloat16)   # (H, 3H)
    bqkv = jnp.concatenate([bq, bk, bv]).reshape(1, 3 * H).astype(jnp.float32)  # (1, 3H)
    gamma_s = jnp.asarray(gamma, jnp.float32).reshape(1)                        # (1,) -> SMEM

    return pl.pallas_call(
        _self_attn_kernel,
        out_shape=jax.ShapeDtypeStruct((B, L, H), jnp.float32),
        in_specs=[
            pl.BlockSpec(memory_space=pltpu.MemorySpace.VMEM),    # x (whole array)
            pl.BlockSpec(memory_space=pltpu.MemorySpace.VMEM),    # Wqkv^T (bf16)
            pl.BlockSpec(memory_space=pltpu.MemorySpace.VMEM),    # fused bias
            pl.BlockSpec(memory_space=pltpu.MemorySpace.SMEM),    # gamma (scalar path)
        ],
        out_specs=pl.BlockSpec(memory_space=pltpu.MemorySpace.VMEM),
    )(x.astype(jnp.float32), wqkv_t, bqkv, gamma_s)


def self_attn_reference(x, wq, wk, wv, bq, bk, bv, gamma):
    """Pure-JAX f32 reference mirroring the PyTorch forward exactly."""
    q = x @ wq.T + bq                                   # (B, L, H)
    k = x @ wk.T + bk
    v = x @ wv.T + bv
    energy = jnp.einsum('bli,blj->bij', q, k)           # (B, H, H)
    attention = jax.nn.softmax(energy, axis=-1)
    out = jnp.einsum('blj,bij->bli', v, attention)      # V @ attention^T
    return gamma * out + x


def self_attn_matched_reference(x, wqkv_t, bqkv, gamma):
    """Reference with the same bf16-matmul / f32-accumulate numerics as the kernel."""
    bf = jnp.bfloat16
    H = x.shape[-1]
    qkv = jnp.einsum('bld,de->ble', x.astype(bf), wqkv_t.astype(bf),
                     preferred_element_type=jnp.float32) + bqkv
    q, k, v = qkv[..., :H], qkv[..., H:2 * H], qkv[..., 2 * H:]
    energy = jnp.einsum('bli,blj->bij', q.astype(bf), k.astype(bf),
                        preferred_element_type=jnp.float32)
    attn = jax.nn.softmax(energy, axis=-1)
    out = jnp.einsum('blj,bij->bli', v.astype(bf), attn.astype(bf),
                     preferred_element_type=jnp.float32)
    return gamma * out + x


if __name__ == "__main__":
    B, L, H = 2, 8, 32   # batch, max_length, hidden_size (= attn_size)

    key = jax.random.PRNGKey(0)
    kx, kwq, kwk, kwv, kbq, kbk, kbv = jax.random.split(key, 7)

    x = jax.random.normal(kx, (B, L, H), dtype=jnp.float32)

    # Deterministic synthetic parameters (shapes from nn.Linear(H, H)).
    bound = 1.0 / (H ** 0.5)
    wq = jax.random.uniform(kwq, (H, H), jnp.float32, -bound, bound)
    wk = jax.random.uniform(kwk, (H, H), jnp.float32, -bound, bound)
    wv = jax.random.uniform(kwv, (H, H), jnp.float32, -bound, bound)
    bq = jax.random.uniform(kbq, (H,), jnp.float32, -bound, bound)
    bk = jax.random.uniform(kbk, (H,), jnp.float32, -bound, bound)
    bv = jax.random.uniform(kbv, (H,), jnp.float32, -bound, bound)
    # The module initializes gamma to zero; use a nonzero value so the
    # attention path is actually exercised/verified.
    gamma = jnp.array([0.5], dtype=jnp.float32)

    out = self_attn_pallas(x, wq, wk, wv, bq, bk, bv, gamma)
    out = jax.block_until_ready(out)
    assert out.shape == (B, L, H)

    # (1) Check against the exact f32 module semantics.  Tolerance is loosened
    #     slightly because the kernel uses bf16 MXU inputs (per perf review).
    ref_f32 = self_attn_reference(x, wq, wk, wv, bq, bk, bv, gamma)
    assert jnp.allclose(out, ref_f32, atol=3e-2, rtol=3e-2), "mismatch vs f32 reference"

    # (2) Tight check against a numerics-matched (bf16-matmul) reference.
    wqkv_t = jnp.concatenate([wq.T, wk.T, wv.T], axis=1)
    bqkv = jnp.concatenate([bq, bk, bv]).reshape(1, 3 * H)
    ref_matched = self_attn_matched_reference(x, wqkv_t, bqkv, gamma)
    assert jnp.allclose(out, ref_matched, atol=5e-3, rtol=5e-3), "mismatch vs matched reference"

    print("KERNEL_OK")
</pallas_src>

<mosaic_0001>
module attributes {stable_mosaic.version = 11 : i64} {
  func.func @_self_attn_kernel(%arg0: memref<2x8x32xf32, #tpu.memory_space<vmem>>, %arg1: memref<32x96xbf16, #tpu.memory_space<vmem>>, %arg2: memref<1x96xf32, #tpu.memory_space<vmem>>, %arg3: memref<1xf32, #tpu.memory_space<smem>>, %arg4: memref<2x8x32xf32, #tpu.memory_space<vmem>>) attributes {dimension_semantics = [], scalar_prefetch = 0 : i64, scratch_operands = 0 : i64, tpu.core_type = #tpu.core_type<tc>} {
    %c0 = arith.constant 0 : index
    %c0_0 = arith.constant 0 : index
    %0 = vector.load %arg1[%c0, %c0_0] : memref<32x96xbf16, #tpu.memory_space<vmem>>, vector<32x96xbf16>
    %c0_1 = arith.constant 0 : index
    %c0_2 = arith.constant 0 : index
    %1 = vector.load %arg2[%c0_1, %c0_2] : memref<1x96xf32, #tpu.memory_space<vmem>>, vector<1x96xf32>
    %c0_3 = arith.constant 0 : index
    %2 = memref.load %arg3[%c0_3] : memref<1xf32, #tpu.memory_space<smem>>
    %c0_4 = arith.constant 0 : index
    %c0_5 = arith.constant 0 : index
    %c0_6 = arith.constant 0 : index
    %3 = vector.load %arg0[%c0_4, %c0_5, %c0_6] : memref<2x8x32xf32, #tpu.memory_space<vmem>>, vector<1x8x32xf32>
    %4 = vector.shape_cast %3 : vector<1x8x32xf32> to vector<8x32xf32>
    %5 = arith.truncf %4 : vector<8x32xf32> to vector<8x32xbf16>
    %cst = arith.constant dense<0.000000e+00> : vector<8x96xf32>
    %6 = tpu.matmul %5, %0, %cst {dimension_numbers = #tpu.dot_dimension_numbers<[1], [0], [0], [1], [0, 0, 1, 1], [], []>} : vector<8x32xbf16>, vector<32x96xbf16>, vector<8x96xf32> -> vector<8x96xf32>
    %7 = vector.broadcast %1 : vector<1x96xf32> to vector<8x96xf32>
    %8 = arith.addf %6, %7 : vector<8x96xf32>
    %9 = vector.extract_strided_slice %8 {offsets = [0, 0], sizes = [8, 32], strides = [1, 1]} : vector<8x96xf32> to vector<8x32xf32>
    %10 = vector.extract_strided_slice %8 {offsets = [0, 32], sizes = [8, 32], strides = [1, 1]} : vector<8x96xf32> to vector<8x32xf32>
    %11 = vector.extract_strided_slice %8 {offsets = [0, 64], sizes = [8, 32], strides = [1, 1]} : vector<8x96xf32> to vector<8x32xf32>
    %12 = arith.truncf %9 : vector<8x32xf32> to vector<8x32xbf16>
    %13 = arith.truncf %10 : vector<8x32xf32> to vector<8x32xbf16>
    %cst_7 = arith.constant dense<0.000000e+00> : vector<32x32xf32>
    %14 = tpu.matmul %12, %13, %cst_7 {dimension_numbers = #tpu.dot_dimension_numbers<[0], [0], [1], [1], [0, 1, 1, 1], [], []>} : vector<8x32xbf16>, vector<8x32xbf16>, vector<32x32xf32> -> vector<32x32xf32>
    %cst_8 = arith.constant dense<0xFF800000> : vector<32xf32>
    %15 = vector.multi_reduction <maximumf>, %14, %cst_8 [1] : vector<32x32xf32> to vector<32xf32>
    %16 = vector.shape_cast %15 : vector<32xf32> to vector<32x1xf32>
    %17 = vector.broadcast %16 : vector<32x1xf32> to vector<32x32xf32>
    %18 = arith.subf %14, %17 : vector<32x32xf32>
    %19 = math.exp %18 : vector<32x32xf32>
    %cst_9 = arith.constant dense<0.000000e+00> : vector<32xf32>
    %20 = vector.multi_reduction <add>, %19, %cst_9 [1] : vector<32x32xf32> to vector<32xf32>
    %21 = vector.shape_cast %20 : vector<32xf32> to vector<32x1xf32>
    %22 = tpu.reciprocal %21 {approx = true} : vector<32x1xf32> -> vector<32x1xf32>
    %23 = vector.broadcast %22 : vector<32x1xf32> to vector<32x32xf32>
    %24 = arith.mulf %19, %23 : vector<32x32xf32>
    %25 = arith.truncf %11 : vector<8x32xf32> to vector<8x32xbf16>
    %26 = arith.truncf %24 : vector<32x32xf32> to vector<32x32xbf16>
    %cst_10 = arith.constant dense<0.000000e+00> : vector<8x32xf32>
    %27 = tpu.matmul %25, %26, %cst_10 {dimension_numbers = #tpu.dot_dimension_numbers<[1], [1], [0], [0], [0, 0, 1, 0], [], []>} : vector<8x32xbf16>, vector<32x32xbf16>, vector<8x32xf32> -> vector<8x32xf32>
    %28 = vector.broadcast %2 : f32 to vector<8x32xf32>
    %29 = arith.mulf %28, %27 : vector<8x32xf32>
    %30 = arith.addf %29, %4 : vector<8x32xf32>
    %c0_11 = arith.constant 0 : index
    %c0_12 = arith.constant 0 : index
    %c0_13 = arith.constant 0 : index
    %31 = vector.load %arg4[%c0_11, %c0_12, %c0_13] : memref<2x8x32xf32, #tpu.memory_space<vmem>>, vector<1x8x32xf32>
    %32 = vector.shape_cast %31 : vector<1x8x32xf32> to vector<8x32xf32>
    %33 = vector.shape_cast %30 : vector<8x32xf32> to vector<1x8x32xf32>
    tpu.vector_store %arg4[%c0_11, %c0_12, %c0_13], %33 {strides = array<i32>} : memref<2x8x32xf32, #tpu.memory_space<vmem>>, vector<1x8x32xf32>,
    %c1 = arith.constant 1 : index
    %c0_14 = arith.constant 0 : index
    %c0_15 = arith.constant 0 : index
    %34 = vector.load %arg0[%c1, %c0_14, %c0_15] : memref<2x8x32xf32, #tpu.memory_space<vmem>>, vector<1x8x32xf32>
    %35 = vector.shape_cast %34 : vector<1x8x32xf32> to vector<8x32xf32>
    %36 = arith.truncf %35 : vector<8x32xf32> to vector<8x32xbf16>
    %cst_16 = arith.constant dense<0.000000e+00> : vector<8x96xf32>
    %37 = tpu.matmul %36, %0, %cst_16 {dimension_numbers = #tpu.dot_dimension_numbers<[1], [0], [0], [1], [0, 0, 1, 1], [], []>} : vector<8x32xbf16>, vector<32x96xbf16>, vector<8x96xf32> -> vector<8x96xf32>
    %38 = vector.broadcast %1 : vector<1x96xf32> to vector<8x96xf32>
    %39 = arith.addf %37, %38 : vector<8x96xf32>
    %40 = vector.extract_strided_slice %39 {offsets = [0, 0], sizes = [8, 32], strides = [1, 1]} : vector<8x96xf32> to vector<8x32xf32>
    %41 = vector.extract_strided_slice %39 {offsets = [0, 32], sizes = [8, 32], strides = [1, 1]} : vector<8x96xf32> to vector<8x32xf32>
    %42 = vector.extract_strided_slice %39 {offsets = [0, 64], sizes = [8, 32], strides = [1, 1]} : vector<8x96xf32> to vector<8x32xf32>
    %43 = arith.truncf %40 : vector<8x32xf32> to vector<8x32xbf16>
    %44 = arith.truncf %41 : vector<8x32xf32> to vector<8x32xbf16>
    %cst_17 = arith.constant dense<0.000000e+00> : vector<32x32xf32>
    %45 = tpu.matmul %43, %44, %cst_17 {dimension_numbers = #tpu.dot_dimension_numbers<[0], [0], [1], [1], [0, 1, 1, 1], [], []>} : vector<8x32xbf16>, vector<8x32xbf16>, vector<32x32xf32> -> vector<32x32xf32>
    %cst_18 = arith.constant dense<0xFF800000> : vector<32xf32>
    %46 = vector.multi_reduction <maximumf>, %45, %cst_18 [1] : vector<32x32xf32> to vector<32xf32>
    %47 = vector.shape_cast %46 : vector<32xf32> to vector<32x1xf32>
    %48 = vector.broadcast %47 : vector<32x1xf32> to vector<32x32xf32>
    %49 = arith.subf %45, %48 : vector<32x32xf32>
    %50 = math.exp %49 : vector<32x32xf32>
    %cst_19 = arith.constant dense<0.000000e+00> : vector<32xf32>
    %51 = vector.multi_reduction <add>, %50, %cst_19 [1] : vector<32x32xf32> to vector<32xf32>
    %52 = vector.shape_cast %51 : vector<32xf32> to vector<32x1xf32>
    %53 = tpu.reciprocal %52 {approx = true} : vector<32x1xf32> -> vector<32x1xf32>
    %54 = vector.broadcast %53 : vector<32x1xf32> to vector<32x32xf32>
    %55 = arith.mulf %50, %54 : vector<32x32xf32>
    %56 = arith.truncf %42 : vector<8x32xf32> to vector<8x32xbf16>
    %57 = arith.truncf %55 : vector<32x32xf32> to vector<32x32xbf16>
    %cst_20 = arith.constant dense<0.000000e+00> : vector<8x32xf32>
    %58 = tpu.matmul %56, %57, %cst_20 {dimension_numbers = #tpu.dot_dimension_numbers<[1], [1], [0], [0], [0, 0, 1, 0], [], []>} : vector<8x32xbf16>, vector<32x32xbf16>, vector<8x32xf32> -> vector<8x32xf32>
    %59 = vector.broadcast %2 : f32 to vector<8x32xf32>
    %60 = arith.mulf %59, %58 : vector<8x32xf32>
    %61 = arith.addf %60, %35 : vector<8x32xf32>
    %c1_21 = arith.constant 1 : index
    %c0_22 = arith.constant 0 : index
    %c0_23 = arith.constant 0 : index
    %62 = vector.load %arg4[%c1_21, %c0_22, %c0_23] : memref<2x8x32xf32, #tpu.memory_space<vmem>>, vector<1x8x32xf32>
    %63 = vector.shape_cast %62 : vector<1x8x32xf32> to vector<8x32xf32>
    %64 = vector.shape_cast %61 : vector<8x32xf32> to vector<1x8x32xf32>
    tpu.vector_store %arg4[%c1_21, %c0_22, %c0_23], %64 {strides = array<i32>} : memref<2x8x32xf32, #tpu.memory_space<vmem>>, vector<1x8x32xf32>,
    return
  }
}

</mosaic_0001>

<bundles_post_ra>
// kernel: tpu_custom_call.1
= control target key start
LH: loop header
LB: loop body
LE: loop exit
PB: predicated region body
PF: predicated region fallthrough
CT: control target
= control target key end

     0   :  { %10 = vsyncpa [#allocation4], 0  ;;  %s893_s0 = inlined_call_operand.hbm [shape: f32[2,8,32], index: 0, kind: input, shape index: {}]   ;;  %s894_s1 = inlined_call_operand.hbm [shape: bf16[32,96], index: 1, kind: input, shape index: {}]   ;;  %s895_s2 = inlined_call_operand.vmem [shape: f32[1,96], index: 2, kind: input, shape index: {}]   ;;  %s896_s3 = inlined_call_operand.<no memory space> [shape: f32[1], index: 3, kind: input, shape index: {}]   ;;  %s897_s4 = inlined_call_operand.hbm [shape: f32[2,8,32], index: 4, kind: output, shape index: {}]  }
   0x1   :  { %11 = vsyncpa [#allocation7], 0 }
   0x2   :  { %12 = vsyncpa [#allocation5], 0  ;;  %s734_s15 = smov [#allocation3]   ;;  %s662_s19 = scalar_lea.hbm %s893_s0, 256 }
   0x3   :  { %s18_s16 = sshll.u32 %s734_s15, 4  ;;  %p663_p0 = scmp.ne.s32.totalorder %s893_s0, %s662_s19  ;;  %s19_s16 = int_to_ptr.vmem [resolvable:$true] %s18_s16 }
   0x4   :  { %p666_p1 = scmp.lt.u32.totalorder %s662_s19, %s893_s0 }
   0x6   :  { %p668_p2 = pnand %p666_p1, %p663_p0 }
   0x8   :  { %671 = shalt.err (!%p668_p2)
}
   0x9   :  { %s672_s24 = scalar_lea.vmem %s19_s16, 256  ;;  %p677_p4 = scmp.lt.s32.totalorder %s19_s16, %s19_s16 }
   0xa   :  { %p673_p3 = scmp.ne.s32.totalorder %s19_s16, %s672_s24  ;;  %p678_p5 = scmp.lt.s32.totalorder %s672_s24, %s672_s24 }
   0xc   :  { %p679_p6 = por %p678_p5, %p677_p4 }
   0xe   :  { %p680_p7 = pnand %p679_p6, %p673_p3 }
  0x10   :  { %683 = shalt.err (!%p680_p7)
}
  0x11   :  { %s735_s25 = smov 128   ;;  %s736_s26 = smov 8  }
  0x12   :  { %24 = dma.hbm_to_vmem [thread:$0]  %s893_s0, 256, %s19_s16, [#allocation4], %s735_s25, %s735_s25, %s736_s26  }
  0x13   :  { %s737_s29 = smov [#allocation6]   ;;  %s684_s7 = scalar_lea.hbm %s894_s1, 256 }
  0x14   :  { %s30_s30 = sshll.u32 %s737_s29, 4  ;;  %p685_p8 = scmp.ne.s32.totalorder %s894_s1, %s684_s7  ;;  %s31_s30 = int_to_ptr.vmem [resolvable:$true] %s30_s30 }
  0x15   :  { %p688_p9 = scmp.lt.u32.totalorder %s684_s7, %s894_s1 }
  0x17   :  { %p690_p10 = pnand %p688_p9, %p685_p8 }
  0x19   :  { %693 = shalt.err (!%p690_p10)
}
  0x1a   :  { %s694_s12 = scalar_lea.vmem %s31_s30, 256  ;;  %p699_p12 = scmp.lt.s32.totalorder %s31_s30, %s31_s30 }
  0x1b   :  { %p695_p11 = scmp.ne.s32.totalorder %s31_s30, %s694_s12  ;;  %p700_p13 = scmp.lt.s32.totalorder %s694_s12, %s694_s12 }
  0x1d   :  { %p701_p0 = por %p700_p13, %p699_p12 }
  0x1f   :  { %p702_p1 = pnand %p701_p0, %p695_p11 }
  0x21   :  { %705 = shalt.err (!%p702_p1)
}
  0x22   :  { %s738_s0 = smov 64   ;;  %s739_s13 = smov 4  }
  0x23   :  { %36 = dma.hbm_to_vmem [thread:$0]  %s894_s1, 256, %s31_s30, [#allocation7], %s738_s0, %s738_s0, %s739_s13  }
  0x24   :  { %728 = dma.done.wait [#allocation4], 256  }
  0x25   :  { %729 = vsyncadd [#allocation4], 4294967040 }
  0x26   :  { %730 = dma.done.wait [#allocation7], 256  }
  0x27   :  { %731 = vsyncadd [#allocation7], 4294967040  ;;  %v740_v0 = vmov 0.0   ;;  %vm741_vm0 = vmmov 0   ;;  %v628_v1 = vld [vmem:[#allocation6] sm:$0xff]   ;;  %v629_v2 = vld [vmem:[#allocation6 + $0x8] sm:$0xff]  }
  0x28   :  { %571 = vmatprep.subr.bf16.mxu0 %v740_v0  ;;  %575 = vmatprep.mubr.msk.bf16.mxu0 %vm741_vm0, %v740_v0  ;;  %v804_v3 = vld [vmem:[#allocation3] sm:$0xff]  ;;  %vm74_vm1 = vcmask 261120   ;;  %s742_s17 = smov 96   ;;  %vm145_vm2 = vcmask 1043456   ;;  %vm138_vm3 = vcmask 64512   ;;  %v825_v16 = vld [vmem:[#allocation3 + $0x8] sm:$0xff] }
  0x29   :  { %585 = vmatprep.subr.bf16.mxu1 %v740_v0  ;;  %589 = vmatprep.mubr.msk.bf16.mxu1 %vm741_vm0, %v740_v0  ;;  %v55_v4 = vpack.c.bf16 %v804_v3, %v804_v3  ;;  %v542_v5 = vld [vmem:[%s895_s2] ss:$0 sm:$0xff]  ;;  %v301_v17 = vpack.c.bf16 %v825_v16, %v825_v16  ;;  %s743_s19 = smov [#allocation8]  }
  0x2a   :  { %572 = vmatpush3.bf16.msra.mxu0 %v628_v1  ;;  %s529_s20 = sshll.u32 %s743_s19, 4  ;;  %s530_s20 = int_to_ptr.vmem [resolvable:$true] %s529_s20 }
  0x2b   :  { %573 = vmatprep.subr.bf16.mxu0 %v740_v0  ;;  %p711_p3 = scmp.lt.s32.totalorder %s530_s20, %s530_s20 }
  0x2e   :  { %574 = vmatpush3.bf16.msra.mxu0 %v629_v2 }
  0x31   :  { %576 = vmatmul.mubr.msk.bf16.vlgmr.msra.gmra.mrb[0].mxu0 %vm74_vm1, %v55_v4 }
 0x104   :  { %v112_v6 = vpop.f32.mrb[0].mxu0 }
 0x105   :  { %v113_v7 = vadd.f32 %v542_v5, %v112_v6  ;;  %v577_v8 = vpop.f32.mrb[1].mxu0 }
 0x106   :  { %v115_v9 = vpop.f32.mrb[2].mxu0 }
 0x107   :  { %v813_v10 = vpack.c.bf16 %v113_v7, %v113_v7  ;;  %v578_v11 = vpop.f32.mrb[3].mxu0 }
 0x109   :  { %136 = vrot.lane.b32.xlu0 %v813_v10, %s742_s17 }
 0x127   :  { %119 = vxpose.xlu0.c.b16.start.end [1/1] (short) (narrow) %v813_v10, 32 }
 0x17b   :  { %v137_v12 = vpop.permute.xlu0 %136 }
 0x17c   :  { %v147_v13 = vsel %vm145_vm2, %v137_v12, 0  ;;  %615 = vmatprep.subr.msk.bf16.mxu0 %vm145_vm2, %v137_v12 }
 0x17d   :  { %580 = vmatpush3.bf16.msra.mxu0 %v147_v13 }
 0x17e   :  { %593 = vmatprep.subr.bf16.mxu0 %v740_v0 }
 0x18d   :  { %v127_v14 = vpop.trf.xlu0 }
 0x18e   :  { %581 = vmatprep.mubr.msk.bf16.mxu0 %vm138_vm3, %v127_v14 }
 0x191   :  { %v128_v15 = vpop.trf.xlu0 }
 0x192   :  { %582 = vmatmul.mubr.msk.bf16.vlgmr.msra.gmra.mrb[4].mxu0 %vm138_vm3, %v128_v15 }
 0x193   :  { %594 = vmatpush3.bf16.msra.mxu0 %v628_v1  ;;  %597 = vmatprep.mubr.msk.bf16.mxu0 %vm741_vm0, %v740_v0 }
 0x194   :  { %595 = vmatprep.subr.bf16.mxu0 %v740_v0 }
 0x197   :  { %596 = vmatpush3.bf16.msra.mxu0 %v629_v2 }
 0x19a   :  { %598 = vmatmul.mubr.msk.bf16.vlgmr.msra.gmra.mrb[8].mxu0 %vm74_vm1, %v301_v17 }
 0x265   :  { %v583_v18 = vpop.f32.mrb[4].mxu0 }
 0x266   :  { %v183_v19 = vpop.f32.mrb[5].mxu0  ;;  %v204_v23 = vsel %vm74_vm1, %v583_v18, -inf }
 0x267   :  { %v584_v20 = vpop.f32.mrb[6].mxu0  ;;  %v198_v21 = vsel %vm74_vm1, %v183_v19, -inf }
 0x268   :  { %199 = vmax.xlane.f32.xlu0 %v198_v21  ;;  %v186_v22 = vpop.f32.mrb[7].mxu0  ;;  %v207_v28 = vsel %vm74_vm1, %v584_v20, -inf }
 0x269   :  { %v201_v31 = vsel %vm74_vm1, %v186_v22, -inf }
 0x26c   :  { %205 = vmax.xlane.f32.xlu0 %v204_v23 }
 0x26d   :  { %v339_v24 = vpop.f32.mrb[8].mxu0 }
 0x26e   :  { %v340_v25 = vadd.f32 %v542_v5, %v339_v24  ;;  %v599_v26 = vpop.f32.mrb[9].mxu0 }
 0x26f   :  { %v342_v27 = vpop.f32.mrb[10].mxu0 }
 0x270   :  { %v834_v29 = vpack.c.bf16 %v340_v25, %v340_v25  ;;  %208 = vmax.xlane.f32.xlu0 %v207_v28  ;;  %v600_v30 = vpop.f32.mrb[11].mxu0 }
 0x272   :  { %363 = vrot.lane.b32.xlu1 %v834_v29, %s742_s17 }
 0x295   :  { %346 = vxpose.xlu1.c.b16.start.end [1/1] (short) (narrow) %v834_v29, 32 }
 0x2a6   :  { %202 = vmax.xlane.f32.xlu1 %v201_v31 }
 0x2e4   :  { %v364_v32 = vpop.permute.xlu1 %363 }
 0x2e5   :  { %v372_v33 = vsel %vm145_vm2, %v364_v32, 0  ;;  %616 = vmatprep.subr.msk.bf16.mxu0 %vm145_vm2, %v364_v32 }
 0x2e6   :  { %602 = vmatpush3.bf16.msra.mxu0 %v372_v33 }
 0x2f5   :  { %v200_v36 = vpop.xlane.xlu0 %199 }
 0x2f6   :  { %v210_v39 = vsub.f32 %v183_v19, %v200_v36 }
 0x2f8   :  { %v214_v42 = vmul.f32 1.442695, %v210_v39 }
 0x2f9   :  { %v206_v37 = vpop.xlane.xlu0 %205 }
 0x2fa   :  { %v212_v43 = vsub.f32 %v583_v18, %v206_v37  ;;  %630 = vpow2.f32 %v214_v42 }
 0x2fb   :  { %v354_v34 = vpop.trf.xlu1 }
 0x2fc   :  { %603 = vmatprep.mubr.msk.bf16.mxu0 %vm138_vm3, %v354_v34  ;;  %v218_v46 = vmul.f32 1.442695, %v212_v43 }
 0x2fd   :  { %v209_v41 = vpop.xlane.xlu0 %208 }
 0x2fe   :  { %v213_v44 = vsub.f32 %v584_v20, %v209_v41 }
 0x2ff   :  { %v355_v35 = vpop.trf.xlu1 }
 0x300   :  { %604 = vmatmul.mubr.msk.bf16.vlgmr.msra.gmra.mrb[12].mxu0 %vm138_vm3, %v355_v35  ;;  %v220_v47 = vmul.f32 1.442695, %v213_v44 }
 0x304   :  { %v631_v55 = vpop.eup %630 }
 0x305   :  { %v222_v58 = vsel %vm74_vm1, %v631_v55, 0.0 }
 0x333   :  { %v203_v38 = vpop.xlane.xlu1 %202 }
 0x334   :  { %v211_v40 = vsub.f32 %v186_v22, %v203_v38 }
 0x336   :  { %v216_v45 = vmul.f32 1.442695, %v211_v40 }
 0x338   :  { %632 = vpow2.f32 %v216_v45 }
 0x339   :  { %634 = vpow2.f32 %v218_v46 }
 0x33a   :  { %636 = vpow2.f32 %v220_v47 }
 0x342   :  { %v633_v57 = vpop.eup %632 }
 0x343   :  { %v635_v59 = vpop.eup %634  ;;  %v225_v60 = vsel %vm74_vm1, %v633_v57, 0.0 }
 0x344   :  { %v637_v61 = vpop.eup %636  ;;  %v228_v62 = vsel %vm74_vm1, %v635_v59, 0.0 }
 0x345   :  { %v231_v63 = vsel %vm74_vm1, %v637_v61, 0.0 }
 0x3d3   :  { %v605_v48 = vpop.f32.mrb[12].mxu0 }
 0x3d4   :  { %v408_v49 = vpop.f32.mrb[13].mxu0  ;;  %v429_v54 = vsel %vm74_vm1, %v605_v48, -inf }
 0x3d5   :  { %v606_v50 = vpop.f32.mrb[14].mxu0  ;;  %v423_v51 = vsel %vm74_vm1, %v408_v49, -inf }
 0x3d6   :  { %v411_v52 = vpop.f32.mrb[15].mxu0  ;;  %424 = vmax.xlane.f32.xlu1 %v423_v51  ;;  %v432_v56 = vsel %vm74_vm1, %v606_v50, -inf }
 0x3d7   :  { %v426_v53 = vsel %vm74_vm1, %v411_v52, -inf }
 0x3d8   :  { %427 = vmax.xlane.f32.xlu0 %v426_v53 }
 0x3da   :  { %430 = vmax.xlane.f32.xlu1 %v429_v54 }
 0x3dc   :  { %433 = vmax.xlane.f32.xlu0 %v432_v56 }
 0x3de   :  { %223 = vadd.xlane.f32.xlu1 %v222_v58 }
 0x3e0   :  { %226 = vadd.xlane.f32.xlu0 %v225_v60 }
 0x3e2   :  { %229 = vadd.xlane.f32.xlu1 %v228_v62 }
 0x3e4   :  { %232 = vadd.xlane.f32.xlu0 %v231_v63 }
 0x463   :  { %v425_v1 = vpop.xlane.xlu1 %424 }
 0x464   :  { %v435_v2 = vsub.f32 %v408_v49, %v425_v1 }
 0x465   :  { %v428_v4 = vpop.xlane.xlu0 %427 }
 0x466   :  { %v439_v5 = vmul.f32 1.442695, %v435_v2  ;;  %v436_v6 = vsub.f32 %v411_v52, %v428_v4 }
 0x467   :  { %v431_v7 = vpop.xlane.xlu1 %430 }
 0x468   :  { %638 = vpow2.f32 %v439_v5  ;;  %v441_v8 = vmul.f32 1.442695, %v436_v6  ;;  %v437_v9 = vsub.f32 %v605_v48, %v431_v7 }
 0x469   :  { %v434_v11 = vpop.xlane.xlu0 %433 }
 0x46a   :  { %640 = vpow2.f32 %v441_v8  ;;  %v443_v12 = vmul.f32 1.442695, %v437_v9  ;;  %v438_v13 = vsub.f32 %v606_v50, %v434_v11 }
 0x46b   :  { %v224_v14 = vpop.xlane.xlu1 %223 }
 0x46c   :  { %642 = vpow2.f32 %v443_v12  ;;  %v445_v15 = vmul.f32 1.442695, %v438_v13 }
 0x46d   :  { %644 = vrcp.f32 %v224_v14  ;;  %v227_v17 = vpop.xlane.xlu0 %226 }
 0x46e   :  { %646 = vpow2.f32 %v445_v15 }
 0x46f   :  { %648 = vrcp.f32 %v227_v17  ;;  %v230_v18 = vpop.xlane.xlu1 %229 }
 0x471   :  { %v233_v19 = vpop.xlane.xlu0 %232 }
 0x472   :  { %v639_v20 = vpop.eup %638  ;;  %650 = vrcp.f32 %v233_v19 }
 0x473   :  { %652 = vrcp.f32 %v230_v18  ;;  %v447_v21 = vsel %vm74_vm1, %v639_v20, 0.0 }
 0x474   :  { %v641_v22 = vpop.eup %640  ;;  %448 = vadd.xlane.f32.xlu1 %v447_v21 }
 0x475   :  { %v450_v23 = vsel %vm74_vm1, %v641_v22, 0.0 }
 0x476   :  { %v643_v24 = vpop.eup %642  ;;  %451 = vadd.xlane.f32.xlu0 %v450_v23 }
 0x477   :  { %v645_v25 = vpop.eup %644  ;;  %v453_v26 = vsel %vm74_vm1, %v643_v24, 0.0 }
 0x478   :  { %v647_v27 = vpop.eup %646  ;;  %454 = vadd.xlane.f32.xlu1 %v453_v26  ;;  %v238_v31 = vmul.f32 %v645_v25, %v631_v55 }
 0x479   :  { %v649_v28 = vpop.eup %648  ;;  %v456_v30 = vsel %vm74_vm1, %v647_v27, 0.0 }
 0x47a   :  { %457 = vadd.xlane.f32.xlu0 %v456_v30  ;;  %v239_v32 = vmul.f32 %v649_v28, %v633_v57  ;;  %v295_v57 = vstv %s896_s3  ;;  %s706_s3 = scalar_lea.vmem %s530_s20, 256 }
 0x47b   :  { %p707_p2 = scmp.ne.s32.totalorder %s530_s20, %s706_s3  ;;  %p712_p4 = scmp.lt.s32.totalorder %s706_s3, %s706_s3 }
 0x47c   :  { %v651_v33 = vpop.eup %650  ;;  %v242_v34 = vpack.c.bf16 %v239_v32, %v238_v31 }
 0x47d   :  { %v653_v35 = vpop.eup %652  ;;  %v241_v37 = vmul.f32 %v651_v33, %v637_v61  ;;  %p713_p5 = por %p712_p4, %p711_p3 }
 0x47e   :  { %v250_v36 = vsel %vm74_vm1, %v242_v34, 0  ;;  %v240_v38 = vmul.f32 %v653_v35, %v635_v59 }
 0x47f   :  { %586 = vmatpush3.bf16.xpose.msra.mxu1 %v250_v36  ;;  %p714_p6 = pnand %p713_p5, %p707_p2 }
 0x480   :  { %587 = vmatprep.subr.bf16.mxu1 %v740_v0  ;;  %v243_v39 = vpack.c.bf16 %v241_v37, %v240_v38 }
 0x482   :  { %v253_v40 = vsel %vm74_vm1, %v243_v39, 0 }
 0x487   :  { %588 = vmatpush3.bf16.xpose.msra.mxu1 %v253_v40 }
 0x488   :  { %607 = vmatprep.subr.bf16.mxu1 %v740_v0 }
 0x489   :  { %244 = vrot.lane.b32.xlu1 %v813_v10, %s738_s0 }
 0x490   :  { %469 = vrot.lane.b32.xlu0 %v834_v29, %s738_s0 }
 0x501   :  { %v449_v41 = vpop.xlane.xlu1 %448 }
 0x502   :  { %654 = vrcp.f32 %v449_v41 }
 0x503   :  { %v452_v42 = vpop.xlane.xlu0 %451 }
 0x504   :  { %656 = vrcp.f32 %v452_v42 }
 0x505   :  { %v455_v43 = vpop.xlane.xlu1 %454 }
 0x506   :  { %658 = vrcp.f32 %v455_v43 }
 0x507   :  { %v458_v44 = vpop.xlane.xlu0 %457 }
 0x508   :  { %660 = vrcp.f32 %v458_v44 }
 0x509   :  { %v245_v45 = vpop.permute.xlu1 %244 }
 0x50a   :  { %590 = vmatmul.mubr.msk.bf16.vlgmr.msra.gmra.mrb[0].mxu1 %vm74_vm1, %v245_v45 }
 0x50b   :  { %611 = vmatprep.mubr.msk.bf16.mxu1 %vm741_vm0, %v740_v0  ;;  %v470_v56 = vpop.permute.xlu0 %469 }
 0x50c   :  { %v655_v46 = vpop.eup %654 }
 0x50d   :  { %v463_v10 = vmul.f32 %v655_v46, %v639_v20 }
 0x50e   :  { %v657_v47 = vpop.eup %656 }
 0x50f   :  { %v464_v48 = vmul.f32 %v657_v47, %v641_v22 }
 0x510   :  { %v659_v49 = vpop.eup %658 }
 0x511   :  { %v467_v29 = vpack.c.bf16 %v464_v48, %v463_v10  ;;  %v465_v53 = vmul.f32 %v659_v49, %v643_v24 }
 0x512   :  { %v661_v50 = vpop.eup %660 }
 0x513   :  { %v475_v51 = vsel %vm74_vm1, %v467_v29, 0  ;;  %v466_v52 = vmul.f32 %v661_v50, %v647_v27 }
 0x514   :  { %608 = vmatpush3.bf16.xpose.msra.mxu1 %v475_v51 }
 0x515   :  { %609 = vmatprep.subr.bf16.mxu1 %v740_v0  ;;  %v468_v54 = vpack.c.bf16 %v466_v52, %v465_v53 }
 0x517   :  { %v478_v55 = vsel %vm74_vm1, %v468_v54, 0 }
 0x51c   :  { %610 = vmatpush3.bf16.xpose.msra.mxu1 %v478_v55 }
 0x523   :  { %612 = vmatmul.mubr.msk.bf16.vlgmr.msra.gmra.mrb[4].mxu1 %vm74_vm1, %v470_v56 }
 0x5dd   :  { %v289_v58 = vpop.f32.mrb[0].mxu1 }
 0x5de   :  { %v296_v59 = vmul.f32 %v295_v57, %v289_v58  ;;  %v591_v60 = vpop.f32.mrb[1].mxu1 }
 0x5df   :  { %v292_v61 = vpop.f32.mrb[2].mxu1 }
 0x5e0   :  { %v297_v62 = vadd.f32 %v296_v59, %v804_v3  ;;  %v592_v63 = vpop.f32.mrb[3].mxu1 }
 0x5e2   :  { %298 = vst.msk [vmem:[#allocation8] sm:$0xff] %vm74_vm1, %v297_v62 }
 0x5f6   :  { %v514_v0 = vpop.f32.mrb[4].mxu1 }
 0x5f7   :  { %v520_v1 = vmul.f32 %v514_v0, %v295_v57  ;;  %v613_v2 = vpop.f32.mrb[5].mxu1 }
 0x5f8   :  { %v517_v4 = vpop.f32.mrb[6].mxu1 }
 0x5f9   :  { %v521_v5 = vadd.f32 %v520_v1, %v825_v16  ;;  %v614_v6 = vpop.f32.mrb[7].mxu1 }
 0x5fb   :  { %523 = vst.msk [vmem:[#allocation8 + $0x8] sm:$0xff] %vm74_vm1, %v521_v5 }
 0x5fc   :  { %717 = shalt.err (!%p714_p6)
}
 0x5fd   :  { %s718_s23 = scalar_lea.hbm %s897_s4, 256 }
 0x5fe   :  { %p719_p7 = scmp.ne.s32.totalorder %s897_s4, %s718_s23  ;;  %p722_p8 = scmp.lt.u32.totalorder %s718_s23, %s897_s4 }
 0x600   :  { %p724_p9 = pnand %p722_p8, %p719_p7 }
 0x602   :  { %727 = shalt.err (!%p724_p9)
}
 0x603   :  { %535 = dma.vmem_to_hbm [thread:$0]  %s530_s20, 256, %s897_s4, [#allocation5], %s735_s25, %s735_s25, %s736_s26  }
 0x604   :  { %732 = dma.done.wait [#allocation5], 256  }
 0x605   :  { %733 = vsyncadd [#allocation5], 4294967040 }
 0x606   :  { %539 = vsyncpa [#allocation4], 1 }
 0x607   :  { %540 = vsyncpa [#allocation7], 1 }
 0x608   :  { %541 = vsyncpa [#allocation5], 1 }

</bundles_post_ra>
